<compile_context>
chip_gen: v6e
topology: v6e:2x2x1
jax: 0.10.0
libtpu: 0.0.40
codegen_flags: <defaults>
</compile_context>

<pallas_src>
import functools

import jax
import jax.numpy as jnp
from jax.experimental import pallas as pl
from jax.experimental.pallas import tpu as pltpu


_LOGITS_VMEM_BUDGET = 24 * 1024 * 1024   # bytes for the double-buffered logits tile
_MAX_ROW_TILE = 1024
_VMEM_LIMIT_BYTES = 48 * 1024 * 1024     # safe on v5e/v6e (128 MiB) and v7x (64 MiB)


def _ce_kernel(logits_ref, labels_ref, loss_ref, valid_ref,
               m_ref, l_ref, picked_ref, sumx_ref,
               *, pad_id, eps, vocab_size, vocab_tile):
    """Grid = (row_block r, vocab_block v); v is the (inner) reduction axis."""
    v = pl.program_id(1)
    n_v = pl.num_programs(1)

    # Reset per-row-block online-logsumexp state at the first vocab chunk.
    @pl.when(v == 0)
    def _():
        m_ref[...] = jnp.full(m_ref.shape, -jnp.inf, dtype=jnp.float32)
        l_ref[...] = jnp.zeros_like(l_ref)
        picked_ref[...] = jnp.zeros_like(picked_ref)
        sumx_ref[...] = jnp.zeros_like(sumx_ref)

    x = logits_ref[...].astype(jnp.float32)          # (TN, TV)
    labels = labels_ref[...]                          # (TN, 1) int32

    # Global vocab index of each lane in this chunk.
    col = jax.lax.broadcasted_iota(jnp.int32, x.shape, 1) + v * vocab_tile

    # Online logsumexp update.
    m_old = m_ref[...]
    m_new = jnp.maximum(m_old, jnp.max(x, axis=-1, keepdims=True))
    l_ref[...] = (l_ref[...] * jnp.exp(m_old - m_new)
                  + jnp.sum(jnp.exp(x - m_new), axis=-1, keepdims=True))
    m_ref[...] = m_new

    # No logp materialization: keep raw-logit partials.
    picked_ref[...] += jnp.sum(jnp.where(col == labels, x, 0.0),
                               axis=-1, keepdims=True)
    sumx_ref[...] += jnp.sum(x, axis=-1, keepdims=True)

    # Finalize on the last vocab chunk: write per-token loss and validity.
    @pl.when(v == n_v - 1)
    def _():
        lse = m_ref[...] + jnp.log(l_ref[...])
        nll = lse - picked_ref[...]
        smooth = lse - sumx_ref[...] * (1.0 / float(vocab_size))
        per_tok = (1.0 - eps) * nll + eps * smooth
        valid = labels != pad_id
        loss_ref[...] = jnp.where(valid, per_tok, 0.0)
        valid_ref[...] = valid.astype(jnp.float32)


def _round_up(x, m):
    return (x + m - 1) // m * m


def _pick_vocab_tile(vocab, max_vocab_tile):
    """Largest multiple of 128 that divides vocab and is <= max_vocab_tile."""
    if vocab <= max_vocab_tile or vocab % 128 != 0:
        return vocab
    for t in range(max_vocab_tile - max_vocab_tile % 128, 127, -128):
        if vocab % t == 0:
            return t
    # TODO(synk): support vocabs with no 128-multiple divisor via a masked last chunk.
    return vocab


def translation_loss(logits, labels, *, pad_id, label_smoothing=0.0,
                     max_vocab_tile=4096, row_tile=None):
    """Equivalent of TranslationLoss.forward(logits, labels)."""
    vocab = logits.shape[-1]
    logits2d = logits.reshape(-1, vocab)                 # (N, V), dtype preserved
    labels2d = labels.reshape(-1, 1).astype(jnp.int32)   # (N, 1)
    n_rows = logits2d.shape[0]

    vocab_tile = _pick_vocab_tile(vocab, max_vocab_tile)

    if row_tile is None:
        itemsize = jnp.dtype(logits2d.dtype).itemsize
        row_tile = _LOGITS_VMEM_BUDGET // (2 * vocab_tile * itemsize)
        row_tile = min(row_tile, _MAX_ROW_TILE, _round_up(n_rows, 8))
        row_tile = max(8, row_tile - row_tile % 8)

    # Pad rows to a row_tile multiple: zero logits, pad_id labels (masked out).
    n_padded = _round_up(n_rows, row_tile)
    if n_padded != n_rows:
        logits2d = jnp.pad(logits2d, ((0, n_padded - n_rows), (0, 0)))
        labels2d = jnp.pad(labels2d, ((0, n_padded - n_rows), (0, 0)),
                           constant_values=pad_id)

    n_row_blocks = n_padded // row_tile
    n_vocab_blocks = vocab // vocab_tile

    kernel = functools.partial(_ce_kernel, pad_id=int(pad_id),
                               eps=float(label_smoothing),
                               vocab_size=vocab, vocab_tile=vocab_tile)

    per_tok, valid = pl.pallas_call(
        kernel,
        out_shape=(jax.ShapeDtypeStruct((n_padded, 1), jnp.float32),
                   jax.ShapeDtypeStruct((n_padded, 1), jnp.float32)),
        grid_spec=pltpu.PrefetchScalarGridSpec(
            num_scalar_prefetch=0,
            grid=(n_row_blocks, n_vocab_blocks),
            in_specs=[
                pl.BlockSpec((row_tile, vocab_tile), lambda r, v: (r, v)),
                pl.BlockSpec((row_tile, 1), lambda r, v: (r, 0)),
            ],
            out_specs=[
                pl.BlockSpec((row_tile, 1), lambda r, v: (r, 0)),
                pl.BlockSpec((row_tile, 1), lambda r, v: (r, 0)),
            ],
            scratch_shapes=[pltpu.VMEM((row_tile, 1), jnp.float32)] * 4,
        ),
        compiler_params=pltpu.CompilerParams(
            dimension_semantics=("parallel", "arbitrary"),
            vmem_limit_bytes=_VMEM_LIMIT_BYTES),
    )(logits2d, labels2d)

    # Mean over non-ignored tokens (NaN if all tokens are pad, matching torch).
    return jnp.sum(per_tok) / jnp.sum(valid)


def _reference_loss(logits, labels, *, pad_id, label_smoothing=0.0):
    """Pure-JAX reference for sanity checking."""
    vocab = logits.shape[-1]
    x = logits.reshape(-1, vocab).astype(jnp.float32)
    y = labels.reshape(-1).astype(jnp.int32)
    logp = jax.nn.log_softmax(x, axis=-1)
    nll = -jnp.take_along_axis(logp, y[:, None], axis=-1)[:, 0]
    smooth = -jnp.mean(logp, axis=-1)
    per_tok = (1.0 - label_smoothing) * nll + label_smoothing * smooth
    valid = (y != pad_id).astype(jnp.float32)
    return jnp.sum(per_tok * valid) / jnp.sum(valid)


if __name__ == "__main__":
    key = jax.random.PRNGKey(0)
    k1, k2, k3, k4 = jax.random.split(key, 4)

    # --- Test 1: small case, single vocab block, f32 ---
    batch, seq, vocab = 2, 8, 128
    pad_id, eps = 0, 0.1
    logits = jax.random.normal(k1, (batch, seq, vocab), dtype=jnp.float32)
    labels = jax.random.randint(k2, (batch, seq), 0, vocab, dtype=jnp.int32)
    labels = labels.at[:, -2:].set(pad_id)           # exercise ignore_index path
    loss = jax.block_until_ready(
        translation_loss(logits, labels, pad_id=pad_id, label_smoothing=eps))
    ref = _reference_loss(logits, labels, pad_id=pad_id, label_smoothing=eps)
    assert jnp.allclose(loss, ref, rtol=1e-5, atol=1e-5), (loss, ref)

    # --- Test 2: bf16 logits, vocab chunking (online logsumexp), row padding ---
    batch, seq, vocab = 3, 11, 512
    pad_id, eps = 1, 0.05
    logits = jax.random.normal(k3, (batch, seq, vocab),
                               dtype=jnp.float32).astype(jnp.bfloat16)
    labels = jax.random.randint(k4, (batch, seq), 0, vocab, dtype=jnp.int32)
    labels = labels.at[:, :2].set(pad_id)
    loss = jax.block_until_ready(
        translation_loss(logits, labels, pad_id=pad_id, label_smoothing=eps,
                         max_vocab_tile=256))        # forces 2 vocab chunks
    ref = _reference_loss(logits, labels, pad_id=pad_id, label_smoothing=eps)
    assert jnp.allclose(loss, ref, rtol=1e-4, atol=1e-4), (loss, ref)

    print("KERNEL_OK")
</pallas_src>

<mosaic_0001>
module attributes {stable_mosaic.version = 11 : i64} {
  func.func @_ce_kernel(%arg0: i32, %arg1: i32, %arg2: memref<16x128xf32, #tpu.memory_space<vmem>>, %arg3: memref<16x1xi32, #tpu.memory_space<vmem>>, %arg4: memref<16x1xf32, #tpu.memory_space<vmem>>, %arg5: memref<16x1xf32, #tpu.memory_space<vmem>>, %arg6: memref<16x1xf32, #tpu.memory_space<vmem>>, %arg7: memref<16x1xf32, #tpu.memory_space<vmem>>, %arg8: memref<16x1xf32, #tpu.memory_space<vmem>>, %arg9: memref<16x1xf32, #tpu.memory_space<vmem>>) attributes {dimension_semantics = [#tpu.dimension_semantics<parallel>, #tpu.dimension_semantics<arbitrary>], iteration_bounds = array<i64: 1, 1>, scalar_prefetch = 0 : i64, scratch_operands = 4 : i64, tpu.core_type = #tpu.core_type<tc>, window_params = [{transform_indices = @transform_0, window_bounds = array<i64: 16, 128>}, {transform_indices = @transform_1, window_bounds = array<i64: 16, 1>}, {transform_indices = @transform_2, window_bounds = array<i64: 16, 1>}, {transform_indices = @transform_3, window_bounds = array<i64: 16, 1>}]} {
    %c0_i32 = arith.constant 0 : i32
    %0 = arith.cmpi eq, %arg1, %c0_i32 : i32
    %1 = arith.extui %0 : i1 to i32
    %c0_i32_0 = arith.constant 0 : i32
    %2 = arith.cmpi ne, %1, %c0_i32_0 : i32
    scf.if %2 {
      %cst_26 = arith.constant 0xFF800000 : f32
      %42 = vector.broadcast %cst_26 : f32 to vector<16x1xf32>
      %c0_27 = arith.constant 0 : index
      %c0_28 = arith.constant 0 : index
      %43 = vector.load %arg6[%c0_27, %c0_28] : memref<16x1xf32, #tpu.memory_space<vmem>>, vector<16x1xf32>
      tpu.vector_store %arg6[%c0_27, %c0_28], %42 {strides = array<i32>} : memref<16x1xf32, #tpu.memory_space<vmem>>, vector<16x1xf32>,
      %cst_29 = arith.constant 0.000000e+00 : f32
      %44 = vector.broadcast %cst_29 : f32 to vector<16x1xf32>
      %c0_30 = arith.constant 0 : index
      %c0_31 = arith.constant 0 : index
      %45 = vector.load %arg7[%c0_30, %c0_31] : memref<16x1xf32, #tpu.memory_space<vmem>>, vector<16x1xf32>
      tpu.vector_store %arg7[%c0_30, %c0_31], %44 {strides = array<i32>} : memref<16x1xf32, #tpu.memory_space<vmem>>, vector<16x1xf32>,
      %cst_32 = arith.constant 0.000000e+00 : f32
      %46 = vector.broadcast %cst_32 : f32 to vector<16x1xf32>
      %c0_33 = arith.constant 0 : index
      %c0_34 = arith.constant 0 : index
      %47 = vector.load %arg8[%c0_33, %c0_34] : memref<16x1xf32, #tpu.memory_space<vmem>>, vector<16x1xf32>
      tpu.vector_store %arg8[%c0_33, %c0_34], %46 {strides = array<i32>} : memref<16x1xf32, #tpu.memory_space<vmem>>, vector<16x1xf32>,
      %cst_35 = arith.constant 0.000000e+00 : f32
      %48 = vector.broadcast %cst_35 : f32 to vector<16x1xf32>
      %c0_36 = arith.constant 0 : index
      %c0_37 = arith.constant 0 : index
      %49 = vector.load %arg9[%c0_36, %c0_37] : memref<16x1xf32, #tpu.memory_space<vmem>>, vector<16x1xf32>
      tpu.vector_store %arg9[%c0_36, %c0_37], %48 {strides = array<i32>} : memref<16x1xf32, #tpu.memory_space<vmem>>, vector<16x1xf32>,
    } else {
    }
    %c0 = arith.constant 0 : index
    %c0_1 = arith.constant 0 : index
    %3 = vector.load %arg2[%c0, %c0_1] : memref<16x128xf32, #tpu.memory_space<vmem>>, vector<16x128xf32>
    %c0_2 = arith.constant 0 : index
    %c0_3 = arith.constant 0 : index
    %4 = vector.load %arg3[%c0_2, %c0_3] : memref<16x1xi32, #tpu.memory_space<vmem>>, vector<16x1xi32>
    %5 = tpu.iota {dimensions = array<i32: 1>} : vector<16x128xi32>
    %c128_i32 = arith.constant 128 : i32
    %6 = arith.muli %arg1, %c128_i32 : i32
    %7 = vector.broadcast %6 : i32 to vector<16x128xi32>
    %8 = arith.addi %5, %7 : vector<16x128xi32>
    %c0_4 = arith.constant 0 : index
    %c0_5 = arith.constant 0 : index
    %9 = vector.load %arg6[%c0_4, %c0_5] : memref<16x1xf32, #tpu.memory_space<vmem>>, vector<16x1xf32>
    %cst = arith.constant dense<0xFF800000> : vector<16xf32>
    %10 = vector.multi_reduction <maximumf>, %3, %cst [1] : vector<16x128xf32> to vector<16xf32>
    %11 = vector.shape_cast %10 : vector<16xf32> to vector<16x1xf32>
    %12 = arith.maximumf %9, %11 : vector<16x1xf32>
    %c0_6 = arith.constant 0 : index
    %c0_7 = arith.constant 0 : index
    %13 = vector.load %arg7[%c0_6, %c0_7] : memref<16x1xf32, #tpu.memory_space<vmem>>, vector<16x1xf32>
    %14 = arith.subf %9, %12 : vector<16x1xf32>
    %15 = math.exp %14 : vector<16x1xf32>
    %16 = arith.mulf %13, %15 : vector<16x1xf32>
    %17 = vector.broadcast %12 : vector<16x1xf32> to vector<16x128xf32>
    %18 = arith.subf %3, %17 : vector<16x128xf32>
    %19 = math.exp %18 : vector<16x128xf32>
    %cst_8 = arith.constant dense<0.000000e+00> : vector<16xf32>
    %20 = vector.multi_reduction <add>, %19, %cst_8 [1] : vector<16x128xf32> to vector<16xf32>
    %21 = vector.shape_cast %20 : vector<16xf32> to vector<16x1xf32>
    %22 = arith.addf %16, %21 : vector<16x1xf32>
    %c0_9 = arith.constant 0 : index
    %c0_10 = arith.constant 0 : index
    %23 = vector.load %arg7[%c0_9, %c0_10] : memref<16x1xf32, #tpu.memory_space<vmem>>, vector<16x1xf32>
    tpu.vector_store %arg7[%c0_9, %c0_10], %22 {strides = array<i32>} : memref<16x1xf32, #tpu.memory_space<vmem>>, vector<16x1xf32>,
    %c0_11 = arith.constant 0 : index
    %c0_12 = arith.constant 0 : index
    %24 = vector.load %arg6[%c0_11, %c0_12] : memref<16x1xf32, #tpu.memory_space<vmem>>, vector<16x1xf32>
    tpu.vector_store %arg6[%c0_11, %c0_12], %12 {strides = array<i32>} : memref<16x1xf32, #tpu.memory_space<vmem>>, vector<16x1xf32>,
    %c0_13 = arith.constant 0 : index
    %c0_14 = arith.constant 0 : index
    %25 = vector.load %arg8[%c0_13, %c0_14] : memref<16x1xf32, #tpu.memory_space<vmem>>, vector<16x1xf32>
    %26 = vector.broadcast %4 : vector<16x1xi32> to vector<16x128xi32>
    %27 = arith.cmpi eq, %8, %26 : vector<16x128xi32>
    %cst_15 = arith.constant 0.000000e+00 : f32
    %28 = vector.broadcast %cst_15 : f32 to vector<16x128xf32>
    %29 = arith.select %27, %3, %28 : vector<16x128xi1>, vector<16x128xf32>
    %cst_16 = arith.constant dense<0.000000e+00> : vector<16xf32>
    %30 = vector.multi_reduction <add>, %29, %cst_16 [1] : vector<16x128xf32> to vector<16xf32>
    %31 = vector.shape_cast %30 : vector<16xf32> to vector<16x1xf32>
    %32 = arith.addf %25, %31 : vector<16x1xf32>
    %c0_17 = arith.constant 0 : index
    %c0_18 = arith.constant 0 : index
    %33 = vector.load %arg8[%c0_17, %c0_18] : memref<16x1xf32, #tpu.memory_space<vmem>>, vector<16x1xf32>
    tpu.vector_store %arg8[%c0_17, %c0_18], %32 {strides = array<i32>} : memref<16x1xf32, #tpu.memory_space<vmem>>, vector<16x1xf32>,
    %c0_19 = arith.constant 0 : index
    %c0_20 = arith.constant 0 : index
    %34 = vector.load %arg9[%c0_19, %c0_20] : memref<16x1xf32, #tpu.memory_space<vmem>>, vector<16x1xf32>
    %cst_21 = arith.constant dense<0.000000e+00> : vector<16xf32>
    %35 = vector.multi_reduction <add>, %3, %cst_21 [1] : vector<16x128xf32> to vector<16xf32>
    %36 = vector.shape_cast %35 : vector<16xf32> to vector<16x1xf32>
    %37 = arith.addf %34, %36 : vector<16x1xf32>
    %c0_22 = arith.constant 0 : index
    %c0_23 = arith.constant 0 : index
    %38 = vector.load %arg9[%c0_22, %c0_23] : memref<16x1xf32, #tpu.memory_space<vmem>>, vector<16x1xf32>
    tpu.vector_store %arg9[%c0_22, %c0_23], %37 {strides = array<i32>} : memref<16x1xf32, #tpu.memory_space<vmem>>, vector<16x1xf32>,
    %c0_i32_24 = arith.constant 0 : i32
    %39 = arith.cmpi eq, %arg1, %c0_i32_24 : i32
    %40 = arith.extui %39 : i1 to i32
    %c0_i32_25 = arith.constant 0 : i32
    %41 = arith.cmpi ne, %40, %c0_i32_25 : i32
    scf.if %41 {
      %c0_26 = arith.constant 0 : index
      %c0_27 = arith.constant 0 : index
      %42 = vector.load %arg6[%c0_26, %c0_27] : memref<16x1xf32, #tpu.memory_space<vmem>>, vector<16x1xf32>
      %c0_28 = arith.constant 0 : index
      %c0_29 = arith.constant 0 : index
      %43 = vector.load %arg7[%c0_28, %c0_29] : memref<16x1xf32, #tpu.memory_space<vmem>>, vector<16x1xf32>
      %44 = math.log %43 : vector<16x1xf32>
      %45 = arith.addf %42, %44 : vector<16x1xf32>
      %c0_30 = arith.constant 0 : index
      %c0_31 = arith.constant 0 : index
      %46 = vector.load %arg8[%c0_30, %c0_31] : memref<16x1xf32, #tpu.memory_space<vmem>>, vector<16x1xf32>
      %47 = arith.subf %45, %46 : vector<16x1xf32>
      %c0_32 = arith.constant 0 : index
      %c0_33 = arith.constant 0 : index
      %48 = vector.load %arg9[%c0_32, %c0_33] : memref<16x1xf32, #tpu.memory_space<vmem>>, vector<16x1xf32>
      %cst_34 = arith.constant 7.812500e-03 : f32
      %49 = vector.broadcast %cst_34 : f32 to vector<16x1xf32>
      %50 = arith.mulf %48, %49 : vector<16x1xf32>
      %51 = arith.subf %45, %50 : vector<16x1xf32>
      %cst_35 = arith.constant 0.899999976 : f32
      %52 = vector.broadcast %cst_35 : f32 to vector<16x1xf32>
      %53 = arith.mulf %52, %47 : vector<16x1xf32>
      %cst_36 = arith.constant 1.000000e-01 : f32
      %54 = vector.broadcast %cst_36 : f32 to vector<16x1xf32>
      %55 = arith.mulf %54, %51 : vector<16x1xf32>
      %56 = arith.addf %53, %55 : vector<16x1xf32>
      %c0_i32_37 = arith.constant 0 : i32
      %57 = vector.broadcast %c0_i32_37 : i32 to vector<16x1xi32>
      %58 = arith.cmpi ne, %4, %57 : vector<16x1xi32>
      %cst_38 = arith.constant 0.000000e+00 : f32
      %59 = vector.broadcast %cst_38 : f32 to vector<16x1xf32>
      %60 = arith.select %58, %56, %59 : vector<16x1xi1>, vector<16x1xf32>
      %c0_39 = arith.constant 0 : index
      %c0_40 = arith.constant 0 : index
      %61 = vector.load %arg4[%c0_39, %c0_40] : memref<16x1xf32, #tpu.memory_space<vmem>>, vector<16x1xf32>
      tpu.vector_store %arg4[%c0_39, %c0_40], %60 {strides = array<i32>} : memref<16x1xf32, #tpu.memory_space<vmem>>, vector<16x1xf32>,
      %62 = arith.extui %58 : vector<16x1xi1> to vector<16x1xi32>
      %63 = arith.sitofp %62 : vector<16x1xi32> to vector<16x1xf32>
      %c0_41 = arith.constant 0 : index
      %c0_42 = arith.constant 0 : index
      %64 = vector.load %arg5[%c0_41, %c0_42] : memref<16x1xf32, #tpu.memory_space<vmem>>, vector<16x1xf32>
      tpu.vector_store %arg5[%c0_41, %c0_42], %63 {strides = array<i32>} : memref<16x1xf32, #tpu.memory_space<vmem>>, vector<16x1xf32>,
    } else {
    }
    return
  }
  func.func @transform_0(%arg0: i32, %arg1: i32) -> (i32, i32) {
    %c0_i32 = arith.constant 0 : i32
    return %arg0, %arg1 : i32, i32
  }
  func.func @transform_1(%arg0: i32, %arg1: i32) -> (i32, i32) {
    %c0_i32 = arith.constant 0 : i32
    %c0_i32_0 = arith.constant 0 : i32
    return %arg0, %c0_i32 : i32, i32
  }
  func.func @transform_2(%arg0: i32, %arg1: i32) -> (i32, i32) {
    %c0_i32 = arith.constant 0 : i32
    %c0_i32_0 = arith.constant 0 : i32
    return %arg0, %c0_i32 : i32, i32
  }
  func.func @transform_3(%arg0: i32, %arg1: i32) -> (i32, i32) {
    %c0_i32 = arith.constant 0 : i32
    %c0_i32_0 = arith.constant 0 : i32
    return %arg0, %c0_i32 : i32, i32
  }
}

</mosaic_0001>

<bundles_post_ra>
// kernel: tpu_custom_call.1
= control target key start
LH: loop header
LB: loop body
LE: loop exit
PB: predicated region body
PF: predicated region fallthrough
CT: control target
= control target key end

     0   :  { %vm17_vm0 = vcmask 7168   ;;  %v178_v1 = vmov -inf   ;;  %v179_v3 = vmov 0   ;;  %v180_v5 = vmov 0.0   ;;  %s261_s0 = inlined_call_operand.vmem [shape: f32[16,128], index: 0, kind: input, shape index: {}]   ;;  %s262_s1 = inlined_call_operand.vmem [shape: s32[16,1], index: 1, kind: input, shape index: {}]   ;;  %s263_s3 = inlined_call_operand.vmem [shape: f32[16,1], index: 3, kind: output, shape index: {1}]   ;;  %s264_s2 = inlined_call_operand.vmem [shape: f32[16,1], index: 2, kind: output, shape index: {0}]  }
   0x1   :  { %v26_v0 = vld [vmem:[%s261_s0] sm:$0xff]  ;;  %18 = vst.msk [vmem:[#allocation2] sm:$0xff] %vm17_vm0, %v178_v1  ;;  %19 = vst.msk [vmem:[#allocation2 + $0x8] sm:$0xff] %vm17_vm0, %v178_v1  ;;  %v27_v2 = vld [vmem:[%s261_s0 + $0x8] sm:$0xff]  ;;  %164 = vset.pattern.permute.xlu1 %v179_v3  ;;  %165 = vset.pattern.permute.xlu0 %v179_v3  ;;  %v30_v24 = vlaneseq }
   0x2   :  { %37 = vmax.xlane.f32.xlu0 %v26_v0  ;;  %v212_v4 = vld [vmem:[%s262_s1 + $0x8] sm:$0xff]  ;;  %20 = vst.msk [vmem:[#allocation3] sm:$0xff] %vm17_vm0, %v180_v5  ;;  %21 = vst.msk [vmem:[#allocation3 + $0x8] sm:$0xff] %vm17_vm0, %v180_v5  ;;  %v224_v6 = vld [vmem:[%s262_s1] sm:$0xff] }
   0x3   :  { %22 = vst.msk [vmem:[#allocation4] sm:$0xff] %vm17_vm0, %v180_v5  ;;  %23 = vst.msk [vmem:[#allocation4 + $0x8] sm:$0xff] %vm17_vm0, %v180_v5  ;;  %vm140_vm1 = vcmp.ne.s32.totalorder %v212_v4, 0  ;;  %vm139_vm2 = vcmp.ne.s32.totalorder %v224_v6, 0  ;;  %v31_v27 = vand.u32 127, %v30_v24 }
   0x4   :  { %24 = vst.msk [vmem:[#allocation5] sm:$0xff] %vm17_vm0, %v180_v5  ;;  %25 = vst.msk [vmem:[#allocation5 + $0x8] sm:$0xff] %vm17_vm0, %v180_v5  ;;  %v160_v7 = vsel %vm140_vm1, 1.0, %v180_v5  ;;  %v159_v8 = vsel %vm139_vm2, 1.0, %v180_v5 }
   0x5   :  { %150 = vst.msk [vmem:[%s263_s3 + $0x8] sm:$0xff] %vm17_vm0, %v160_v7  ;;  %149 = vst.msk [vmem:[%s263_s3] sm:$0xff] %vm17_vm0, %v159_v8 }
   0x6   :  { %39 = vmax.xlane.f32.xlu0 %v27_v2 }
   0x8   :  { %v35_v9 = vld [vmem:[#allocation2] sm:$0xff]  ;;  %v36_v12 = vld [vmem:[#allocation2 + $0x8] sm:$0xff] }
   0x9   :  { %v43_v37 = vld [vmem:[#allocation3] sm:$0xff]  ;;  %v44_v41 = vld [vmem:[#allocation3 + $0x8] sm:$0xff] }
   0xa   :  { %v80_v50 = vld [vmem:[#allocation4] sm:$0xff]  ;;  %v81_v54 = vld [vmem:[#allocation4 + $0x8] sm:$0xff] }
   0xb   :  { %v100_v31 = vld [vmem:[#allocation5] sm:$0xff]  ;;  %v101_v46 = vld [vmem:[#allocation5 + $0x8] sm:$0xff] }
  0x1c   :  { %83 = vperm.xlu0 %165, %v224_v6  }
  0x3b   :  { %102 = vadd.xlane.f32.xlu0 %v26_v0 }
  0x8b   :  { %v38_v10 = vpop.xlane.xlu0 %37 }
  0x8c   :  { %v41_v11 = vmax.f32 %v35_v9, %v38_v10 }
  0x8e   :  { %v45_v13 = vsub.f32 %v35_v9, %v41_v11  ;;  %78 = vst.msk [vmem:[#allocation2] sm:$0xff] %vm17_vm0, %v41_v11  ;;  %55 = vperm.xlu1 %164, %v41_v11  }
  0x8f   :  { %v40_v14 = vpop.xlane.xlu0 %39 }
  0x90   :  { %v42_v15 = vmax.f32 %v36_v12, %v40_v14  ;;  %v47_v34 = vmul.f32 1.442695, %v45_v13 }
  0x92   :  { %v46_v16 = vsub.f32 %v36_v12, %v42_v15  ;;  %79 = vst.msk [vmem:[#allocation2 + $0x8] sm:$0xff] %vm17_vm0, %v42_v15  ;;  %60 = vperm.xlu1 %164, %v42_v15  }
  0x94   :  { %v49_v35 = vmul.f32 1.442695, %v46_v16 }
  0x95   :  { %v113_v61 = vld [vmem:[#allocation2] sm:$0xff] }
  0x96   :  { %86 = vperm.xlu1 %164, %v212_v4  }
  0x97   :  { %v84_v26 = vpop.permute.xlu0 %83 }
  0x98   :  { %vm88_vm3 = vcmp.eq.s32.totalorder %v31_v27, %v84_v26 }
  0x99   :  { %v90_v29 = vsel %vm88_vm3, %v26_v0, 0.0  ;;  %v114_v7 = vld [vmem:[#allocation2 + $0x8] sm:$0xff] }
  0xc4   :  { %v103_v32 = vpop.xlane.xlu0 %102 }
  0xc5   :  { %v106_v33 = vadd.f32 %v103_v32, %v100_v31 }
  0xc7   :  { %108 = vst.msk [vmem:[#allocation5] sm:$0xff] %vm17_vm0, %v106_v33 }
  0xce   :  { %v127_v57 = vld [vmem:[#allocation5] sm:$0xff] }
  0xcf   :  { %v129_v60 = vmul.f32 0.0078125, %v127_v57 }
 0x109   :  { %v56_v17 = vpop.permute.xlu1 %55 }
 0x10a   :  { %v63_v18 = vsub.f32 %v26_v0, %v56_v17 }
 0x10c   :  { %v65_v19 = vmul.f32 1.442695, %v63_v18 }
 0x10d   :  { %v61_v20 = vpop.permute.xlu1 %60 }
 0x10e   :  { %166 = vpow2.f32 %v65_v19  ;;  %v64_v21 = vsub.f32 %v27_v2, %v61_v20 }
 0x110   :  { %v67_v22 = vmul.f32 1.442695, %v64_v21 }
 0x111   :  { %v87_v28 = vpop.permute.xlu1 %86 }
 0x112   :  { %168 = vpow2.f32 %v67_v22  ;;  %vm89_vm4 = vcmp.eq.s32.totalorder %v31_v27, %v87_v28 }
 0x113   :  { %v91_v30 = vsel %vm89_vm4, %v27_v2, 0.0  ;;  %170 = vpow2.f32 %v47_v34 }
 0x114   :  { %172 = vpow2.f32 %v49_v35 }
 0x11b   :  { %v167_v23 = vpop.eup %166 }
 0x11c   :  { %69 = vadd.xlane.f32.xlu1 %v167_v23 }
 0x11f   :  { %v169_v25 = vpop.eup %168 }
 0x120   :  { %71 = vadd.xlane.f32.xlu1 %v169_v25  ;;  %v171_v36 = vpop.eup %170 }
 0x121   :  { %v51_v38 = vmul.f32 %v171_v36, %v43_v37  ;;  %v173_v39 = vpop.eup %172 }
 0x122   :  { %v52_v43 = vmul.f32 %v173_v39, %v44_v41 }
 0x124   :  { %104 = vadd.xlane.f32.xlu1 %v27_v2 }
 0x128   :  { %92 = vadd.xlane.f32.xlu1 %v90_v29 }
 0x12c   :  { %94 = vadd.xlane.f32.xlu1 %v91_v30 }
 0x1a5   :  { %v70_v40 = vpop.xlane.xlu1 %69 }
 0x1a6   :  { %v73_v42 = vadd.f32 %v70_v40, %v51_v38 }
 0x1a8   :  { %76 = vst.msk [vmem:[#allocation3] sm:$0xff] %vm17_vm0, %v73_v42 }
 0x1a9   :  { %v72_v44 = vpop.xlane.xlu1 %71 }
 0x1aa   :  { %v74_v45 = vadd.f32 %v72_v44, %v52_v43 }
 0x1ac   :  { %77 = vst.msk [vmem:[#allocation3 + $0x8] sm:$0xff] %vm17_vm0, %v74_v45 }
 0x1ad   :  { %v105_v47 = vpop.xlane.xlu1 %104 }
 0x1ae   :  { %v107_v48 = vadd.f32 %v105_v47, %v101_v46 }
 0x1af   :  { %v115_v49 = vld [vmem:[#allocation3] sm:$0xff] }
 0x1b0   :  { %174 = vlog2.f32 %v115_v49  ;;  %109 = vst.msk [vmem:[#allocation5 + $0x8] sm:$0xff] %vm17_vm0, %v107_v48 }
 0x1b1   :  { %v93_v51 = vpop.xlane.xlu1 %92 }
 0x1b2   :  { %v96_v52 = vadd.f32 %v93_v51, %v80_v50 }
 0x1b3   :  { %v116_v53 = vld [vmem:[#allocation3 + $0x8] sm:$0xff] }
 0x1b4   :  { %176 = vlog2.f32 %v116_v53  ;;  %98 = vst.msk [vmem:[#allocation4] sm:$0xff] %vm17_vm0, %v96_v52 }
 0x1b5   :  { %v95_v55 = vpop.xlane.xlu1 %94 }
 0x1b6   :  { %v97_v56 = vadd.f32 %v95_v55, %v81_v54 }
 0x1b7   :  { %v128_v1 = vld [vmem:[#allocation5 + $0x8] sm:$0xff] }
 0x1b8   :  { %99 = vst.msk [vmem:[#allocation4 + $0x8] sm:$0xff] %vm17_vm0, %v97_v56  ;;  %v130_v9 = vmul.f32 0.0078125, %v128_v1 }
 0x1bb   :  { %v123_v62 = vld [vmem:[#allocation4] sm:$0xff] }
 0x1bd   :  { %v175_v58 = vpop.eup %174 }
 0x1be   :  { %v118_v59 = vmul.f32 0.6931472, %v175_v58 }
 0x1bf   :  { %v124_v12 = vld [vmem:[#allocation4 + $0x8] sm:$0xff] }
 0x1c0   :  { %v121_v63 = vadd.f32 %v118_v59, %v113_v61 }
 0x1c1   :  { %v177_v0 = vpop.eup %176 }
 0x1c2   :  { %v120_v2 = vmul.f32 0.6931472, %v177_v0  ;;  %v125_v3 = vsub.f32 %v121_v63, %v123_v62  ;;  %v131_v5 = vsub.f32 %v121_v63, %v129_v60 }
 0x1c4   :  { %v122_v8 = vadd.f32 %v120_v2, %v114_v7  ;;  %v133_v10 = vmul.f32 0.9, %v125_v3  ;;  %v135_v11 = vmul.f32 0.1, %v131_v5 }
 0x1c6   :  { %v132_v13 = vsub.f32 %v122_v8, %v130_v9  ;;  %v126_v14 = vsub.f32 %v122_v8, %v124_v12  ;;  %v137_v15 = vadd.f32 %v135_v11, %v133_v10 }
 0x1c8   :  { %v136_v16 = vmul.f32 0.1, %v132_v13  ;;  %v134_v17 = vmul.f32 0.9, %v126_v14  ;;  %v141_v18 = vsel %vm139_vm2, %v137_v15, 0.0 }
 0x1c9   :  { %143 = vst.msk [vmem:[%s264_s2] sm:$0xff] %vm17_vm0, %v141_v18 }
 0x1ca   :  { %v138_v19 = vadd.f32 %v136_v16, %v134_v17 }
 0x1cc   :  { %v142_v20 = vsel %vm140_vm1, %v138_v19, 0.0 }
 0x1cd   :  { %144 = vst.msk [vmem:[%s264_s2 + $0x8] sm:$0xff] %vm17_vm0, %v142_v20 }

</bundles_post_ra>
